<compile_context>
chip_gen: v7x
topology: tpu7x:2x2x1
jax: 0.10.0
libtpu: 0.0.40
codegen_flags: <defaults>
</compile_context>

<pallas_src>
import functools

import jax
import jax.numpy as jnp
from jax.experimental import pallas as pl
from jax.experimental.pallas import tpu as pltpu


def _round_up(n, m):
    return (n + m - 1) // m * m


def _weight_gen_kernel(x_ref,
                       w1_ref, b1_ref,
                       w2_ref, b2_ref,
                       wh_ref, bh_ref,
                       out_ref,
                       *, num_classifiers, wts_offset):
    # x arrives f32 (its HBM stream is tiny); cast to bf16 on the VPU for the MXU.
    x = x_ref[...].astype(w1_ref.dtype)

    # fc1 + relu (bf16 MXU operands, f32 accumulate, f32 elementwise)
    h = jnp.dot(x, w1_ref[...], preferred_element_type=jnp.float32) + b1_ref[...]
    h = jnp.maximum(h, 0.0).astype(w2_ref.dtype)

    # fc2 + relu
    h = jnp.dot(h, w2_ref[...], preferred_element_type=jnp.float32) + b2_ref[...]
    h = jnp.maximum(h, 0.0).astype(wh_ref.dtype)

    # Fused heads: ONE MXU matmul producing a single 128-lane slab.
    #   lanes [0, C)                      -> activation logits
    #   lanes [wts_offset, wts_offset+C)  -> softmax logits
    heads = jnp.dot(h, wh_ref[...], preferred_element_type=jnp.float32) + bh_ref[...]

    lane = jax.lax.broadcasted_iota(jnp.int32, heads.shape, 1)
    is_wts_lane = (lane >= wts_offset) & (lane < wts_offset + num_classifiers)

    # Softmax only over the real classifier lanes; everything else gets a
    # -1e30 f32 bias so exp() == 0 and the max/sum are unaffected.
    logits = jnp.where(is_wts_lane, heads, -1e30)
    m = jnp.max(logits, axis=-1, keepdims=True)
    e = jnp.exp(logits - m)
    s = jnp.sum(e, axis=-1, keepdims=True)
    wts = e / s            # exact division: rows sum to 1 (approx recip did not)

    # Merge both heads into one slab and do a single lane-dense (128-wide)
    # unmasked bf16 store.
    out = jnp.where(lane < wts_offset, heads, wts)
    out_ref[...] = out.astype(out_ref.dtype)


def make_forward(raw_params, *,
                 compute_dtype=jnp.bfloat16,
                 out_dtype=jnp.bfloat16,
                 tile_b=4096,
                 min_pallas_batch=512,
                 force_pallas=False,
                 vmem_limit_bytes=32 * 1024 * 1024):
    """Build a jitted forward(x) -> (activation_logits, weight_scores).

    Head fusion / padding and all weight dtype casts are done ONCE here
    (hoisted out of the per-call path).
    """
    input_dim, hidden = raw_params["w1"].shape
    C = raw_params["wa"].shape[1]

    if C <= 64:
        wts_offset, slab = 64, 128        # both heads share one 128-lane slab
    else:
        wts_offset = _round_up(C, 128)    # general fallback for wide heads
        slab = 2 * wts_offset

    # Fused + lane-padded head weights/biases (built once).
    wh = jnp.zeros((hidden, slab), jnp.float32)
    wh = wh.at[:, :C].set(raw_params["wa"])
    wh = wh.at[:, wts_offset:wts_offset + C].set(raw_params["ww"])
    bh = jnp.zeros((1, slab), jnp.float32)
    bh = bh.at[:, :C].set(raw_params["ba"][0])
    bh = bh.at[:, wts_offset:wts_offset + C].set(raw_params["bw"][0])

    # bf16 MXU operands; biases stay f32 (added after f32 accumulation).
    w1 = raw_params["w1"].astype(compute_dtype)
    w2 = raw_params["w2"].astype(compute_dtype)
    wh = wh.astype(compute_dtype)
    b1 = raw_params["b1"].astype(jnp.float32)
    b2 = raw_params["b2"].astype(jnp.float32)
    bh = bh.astype(jnp.float32)

    kernel = functools.partial(_weight_gen_kernel,
                               num_classifiers=C, wts_offset=wts_offset)

    @jax.jit
    def forward(x):
        B = x.shape[0]
        # Tiny batches: Pallas dispatch overhead dwarfs the work.
        if B < min_pallas_batch and not force_pallas:
            return reference_forward(x, raw_params)

        tb = min(tile_b, _round_up(B, 8))
        B_pad = _round_up(B, tb)
        x_p = x if B_pad == B else jnp.pad(x, ((0, B_pad - B), (0, 0)))
        grid = (B_pad // tb,)

        def rep(shape):  # grid-invariant (replicated / resident) operand
            return pl.BlockSpec(shape, lambda i: (0, 0))

        itemsize = jnp.dtype(compute_dtype).itemsize
        flops = 2 * B_pad * (input_dim * hidden + hidden * hidden + hidden * slab)
        bytes_accessed = (B_pad * input_dim * 4
                          + (w1.size + w2.size + wh.size) * itemsize
                          + (b1.size + b2.size + bh.size) * 4
                          + B_pad * slab * jnp.dtype(out_dtype).itemsize)
        cost = pl.CostEstimate(flops=int(flops),
                               transcendentals=int(B_pad * slab),
                               bytes_accessed=int(bytes_accessed))

        out = pl.pallas_call(
            kernel,
            out_shape=jax.ShapeDtypeStruct((B_pad, slab), out_dtype),
            grid=grid,
            in_specs=[
                pl.BlockSpec((tb, input_dim), lambda i: (i, 0)),   # x batch tiles
                rep((input_dim, hidden)),                          # w1
                rep((1, hidden)),                                  # b1
                rep((hidden, hidden)),                             # w2
                rep((1, hidden)),                                  # b2
                rep((hidden, slab)),                               # fused head W
                rep((1, slab)),                                    # fused head b
            ],
            out_specs=pl.BlockSpec((tb, slab), lambda i: (i, 0)),
            compiler_params=pltpu.CompilerParams(
                dimension_semantics=("parallel",),
                vmem_limit_bytes=vmem_limit_bytes),
            cost_estimate=cost,
        )(x_p, w1, b1, w2, b2, wh, bh)

        act = out[:B, :C].astype(jnp.float32)
        wts = out[:B, wts_offset:wts_offset + C].astype(jnp.float32)
        return act, wts

    return forward


def init_params(key, input_dim=7, hidden_dim=32, num_classifiers=11):
    """PyTorch-style nn.Linear init; weights stored [in_features, out_features]."""
    def linear(k, fan_in, fan_out):
        kw, kb = jax.random.split(k)
        bound = 1.0 / jnp.sqrt(float(fan_in))
        w = jax.random.uniform(kw, (fan_in, fan_out), jnp.float32, -bound, bound)
        b = jax.random.uniform(kb, (1, fan_out), jnp.float32, -bound, bound)
        return w, b

    k1, k2, k3, k4 = jax.random.split(key, 4)
    w1, b1 = linear(k1, input_dim, hidden_dim)
    w2, b2 = linear(k2, hidden_dim, hidden_dim)
    wa, ba = linear(k3, hidden_dim, num_classifiers)
    ww, bw = linear(k4, hidden_dim, num_classifiers)
    return dict(w1=w1, b1=b1, w2=w2, b2=b2, wa=wa, ba=ba, ww=ww, bw=bw)


def reference_forward(x, p):
    h = jax.nn.relu(x @ p["w1"] + p["b1"])
    h = jax.nn.relu(h @ p["w2"] + p["b2"])
    act = h @ p["wa"] + p["ba"]
    wts = jax.nn.softmax(h @ p["ww"] + p["bw"], axis=1)
    return act, wts


if __name__ == "__main__":
    key = jax.random.PRNGKey(0)
    k_params, k_x1, k_x2 = jax.random.split(key, 3)

    input_dim, hidden_dim, num_classifiers = 7, 32, 11
    params = init_params(k_params, input_dim, hidden_dim, num_classifiers)

    # Forwards are built once (head fusion + casts hoisted), then jitted.
    fwd_small = make_forward(params, force_pallas=True)
    fwd_big = make_forward(params, tile_b=512, force_pallas=True)

    # 1) small-shape run (single grid step), forced through the Pallas path
    x_small = jax.random.normal(k_x1, (8, input_dim), jnp.float32)
    act_s, wts_s = fwd_small(x_small)
    jax.block_until_ready((act_s, wts_s))

    # 2) gridded / pipelined run (several batch tiles; batch not a multiple of
    #    the tile to exercise the padding path)
    x_big = jax.random.normal(k_x2, (2088, input_dim), jnp.float32)
    act_b, wts_b = fwd_big(x_big)
    jax.block_until_ready((act_b, wts_b))

    for x_t, act, wts in ((x_small, act_s, wts_s), (x_big, act_b, wts_b)):
        ref_act, ref_wts = reference_forward(x_t, params)
        assert act.shape == (x_t.shape[0], num_classifiers)
        assert wts.shape == (x_t.shape[0], num_classifiers)
        # bf16 MXU operands + bf16 output slab -> loosened tolerances vs the
        # pure-f32 reference
        assert jnp.allclose(act, ref_act, atol=5e-2, rtol=5e-2)
        assert jnp.allclose(wts, ref_wts, atol=2e-2, rtol=5e-2)
        # softmax uses exact division in-kernel; residual row-sum error is
        # only the bf16 output quantization (~1e-3 per row typically)
        assert jnp.allclose(jnp.sum(wts, axis=1), 1.0, atol=1e-2)

    print("KERNEL_OK")
</pallas_src>

<mosaic_0001>
module attributes {stable_mosaic.version = 11 : i64} {
  func.func @_weight_gen_kernel(%arg0: i32, %arg1: memref<8x7xf32, #tpu.memory_space<vmem>>, %arg2: memref<7x32xbf16, #tpu.memory_space<vmem>>, %arg3: memref<1x32xf32, #tpu.memory_space<vmem>>, %arg4: memref<32x32xbf16, #tpu.memory_space<vmem>>, %arg5: memref<1x32xf32, #tpu.memory_space<vmem>>, %arg6: memref<32x128xbf16, #tpu.memory_space<vmem>>, %arg7: memref<1x128xf32, #tpu.memory_space<vmem>>, %arg8: memref<8x128xbf16, #tpu.memory_space<vmem>>) attributes {dimension_semantics = [#tpu.dimension_semantics<parallel>], iteration_bounds = array<i64: 1>, scalar_prefetch = 0 : i64, scratch_operands = 0 : i64, tpu.core_type = #tpu.core_type<tc>, window_params = [{transform_indices = @transform_0, window_bounds = array<i64: 8, 7>}, {pipeline_mode = #tpu.pipeline_mode<synchronous>, transform_indices = @transform_1, window_bounds = array<i64: 7, 32>}, {pipeline_mode = #tpu.pipeline_mode<synchronous>, transform_indices = @transform_2, window_bounds = array<i64: 1, 32>}, {pipeline_mode = #tpu.pipeline_mode<synchronous>, transform_indices = @transform_3, window_bounds = array<i64: 32, 32>}, {pipeline_mode = #tpu.pipeline_mode<synchronous>, transform_indices = @transform_4, window_bounds = array<i64: 1, 32>}, {pipeline_mode = #tpu.pipeline_mode<synchronous>, transform_indices = @transform_5, window_bounds = array<i64: 32, 128>}, {pipeline_mode = #tpu.pipeline_mode<synchronous>, transform_indices = @transform_6, window_bounds = array<i64: 1, 128>}, {transform_indices = @transform_7, window_bounds = array<i64: 8, 128>}]} {
    %c0 = arith.constant 0 : index
    %c0_0 = arith.constant 0 : index
    %0 = vector.load %arg1[%c0, %c0_0] : memref<8x7xf32, #tpu.memory_space<vmem>>, vector<8x7xf32>
    %1 = arith.truncf %0 : vector<8x7xf32> to vector<8x7xbf16>
    %c0_1 = arith.constant 0 : index
    %c0_2 = arith.constant 0 : index
    %2 = vector.load %arg2[%c0_1, %c0_2] : memref<7x32xbf16, #tpu.memory_space<vmem>>, vector<7x32xbf16>
    %cst = arith.constant dense<0.000000e+00> : vector<8x32xf32>
    %3 = tpu.matmul %1, %2, %cst {dimension_numbers = #tpu.dot_dimension_numbers<[1], [0], [0], [1], [0, 0, 1, 1], [], []>} : vector<8x7xbf16>, vector<7x32xbf16>, vector<8x32xf32> -> vector<8x32xf32>
    %c0_3 = arith.constant 0 : index
    %c0_4 = arith.constant 0 : index
    %4 = vector.load %arg3[%c0_3, %c0_4] : memref<1x32xf32, #tpu.memory_space<vmem>>, vector<1x32xf32>
    %5 = vector.broadcast %4 : vector<1x32xf32> to vector<8x32xf32>
    %6 = arith.addf %3, %5 : vector<8x32xf32>
    %cst_5 = arith.constant 0.000000e+00 : f32
    %7 = vector.broadcast %cst_5 : f32 to vector<8x32xf32>
    %8 = arith.maximumf %6, %7 : vector<8x32xf32>
    %9 = arith.truncf %8 : vector<8x32xf32> to vector<8x32xbf16>
    %c0_6 = arith.constant 0 : index
    %c0_7 = arith.constant 0 : index
    %10 = vector.load %arg4[%c0_6, %c0_7] : memref<32x32xbf16, #tpu.memory_space<vmem>>, vector<32x32xbf16>
    %cst_8 = arith.constant dense<0.000000e+00> : vector<8x32xf32>
    %11 = tpu.matmul %9, %10, %cst_8 {dimension_numbers = #tpu.dot_dimension_numbers<[1], [0], [0], [1], [0, 0, 1, 1], [], []>} : vector<8x32xbf16>, vector<32x32xbf16>, vector<8x32xf32> -> vector<8x32xf32>
    %c0_9 = arith.constant 0 : index
    %c0_10 = arith.constant 0 : index
    %12 = vector.load %arg5[%c0_9, %c0_10] : memref<1x32xf32, #tpu.memory_space<vmem>>, vector<1x32xf32>
    %13 = vector.broadcast %12 : vector<1x32xf32> to vector<8x32xf32>
    %14 = arith.addf %11, %13 : vector<8x32xf32>
    %cst_11 = arith.constant 0.000000e+00 : f32
    %15 = vector.broadcast %cst_11 : f32 to vector<8x32xf32>
    %16 = arith.maximumf %14, %15 : vector<8x32xf32>
    %17 = arith.truncf %16 : vector<8x32xf32> to vector<8x32xbf16>
    %c0_12 = arith.constant 0 : index
    %c0_13 = arith.constant 0 : index
    %18 = vector.load %arg6[%c0_12, %c0_13] : memref<32x128xbf16, #tpu.memory_space<vmem>>, vector<32x128xbf16>
    %cst_14 = arith.constant dense<0.000000e+00> : vector<8x128xf32>
    %19 = tpu.matmul %17, %18, %cst_14 {dimension_numbers = #tpu.dot_dimension_numbers<[1], [0], [0], [1], [0, 0, 1, 1], [], []>} : vector<8x32xbf16>, vector<32x128xbf16>, vector<8x128xf32> -> vector<8x128xf32>
    %c0_15 = arith.constant 0 : index
    %c0_16 = arith.constant 0 : index
    %20 = vector.load %arg7[%c0_15, %c0_16] : memref<1x128xf32, #tpu.memory_space<vmem>>, vector<1x128xf32>
    %21 = vector.broadcast %20 : vector<1x128xf32> to vector<8x128xf32>
    %22 = arith.addf %19, %21 : vector<8x128xf32>
    %23 = tpu.iota {dimensions = array<i32: 1>} : vector<8x128xi32>
    %c64_i32 = arith.constant 64 : i32
    %24 = vector.broadcast %c64_i32 : i32 to vector<8x128xi32>
    %25 = arith.cmpi sge, %23, %24 : vector<8x128xi32>
    %c75_i32 = arith.constant 75 : i32
    %26 = vector.broadcast %c75_i32 : i32 to vector<8x128xi32>
    %27 = arith.cmpi slt, %23, %26 : vector<8x128xi32>
    %28 = arith.andi %25, %27 : vector<8x128xi1>
    %cst_17 = arith.constant -1.000000e+30 : f32
    %29 = vector.broadcast %cst_17 : f32 to vector<8x128xf32>
    %30 = arith.select %28, %22, %29 : vector<8x128xi1>, vector<8x128xf32>
    %cst_18 = arith.constant dense<0xFF800000> : vector<8xf32>
    %31 = vector.multi_reduction <maximumf>, %30, %cst_18 [1] : vector<8x128xf32> to vector<8xf32>
    %32 = vector.shape_cast %31 : vector<8xf32> to vector<8x1xf32>
    %33 = vector.broadcast %32 : vector<8x1xf32> to vector<8x128xf32>
    %34 = arith.subf %30, %33 : vector<8x128xf32>
    %35 = math.exp %34 : vector<8x128xf32>
    %cst_19 = arith.constant dense<0.000000e+00> : vector<8xf32>
    %36 = vector.multi_reduction <add>, %35, %cst_19 [1] : vector<8x128xf32> to vector<8xf32>
    %37 = vector.shape_cast %36 : vector<8xf32> to vector<8x1xf32>
    %38 = vector.broadcast %37 : vector<8x1xf32> to vector<8x128xf32>
    %39 = arith.divf %35, %38 : vector<8x128xf32>
    %c64_i32_20 = arith.constant 64 : i32
    %40 = vector.broadcast %c64_i32_20 : i32 to vector<8x128xi32>
    %41 = arith.cmpi slt, %23, %40 : vector<8x128xi32>
    %42 = arith.select %41, %22, %39 : vector<8x128xi1>, vector<8x128xf32>
    %43 = arith.truncf %42 : vector<8x128xf32> to vector<8x128xbf16>
    %c0_21 = arith.constant 0 : index
    %c0_22 = arith.constant 0 : index
    %44 = vector.load %arg8[%c0_21, %c0_22] : memref<8x128xbf16, #tpu.memory_space<vmem>>, vector<8x128xbf16>
    tpu.vector_store %arg8[%c0_21, %c0_22], %43 {strides = array<i32>} : memref<8x128xbf16, #tpu.memory_space<vmem>>, vector<8x128xbf16>,
    return
  }
  func.func @transform_0(%arg0: i32) -> (i32, i32) {
    %c0_i32 = arith.constant 0 : i32
    %c0_i32_0 = arith.constant 0 : i32
    return %arg0, %c0_i32 : i32, i32
  }
  func.func @transform_1(%arg0: i32) -> (i32, i32) {
    %c0_i32 = arith.constant 0 : i32
    %c0_i32_0 = arith.constant 0 : i32
    %c0_i32_1 = arith.constant 0 : i32
    return %c0_i32, %c0_i32_0 : i32, i32
  }
  func.func @transform_2(%arg0: i32) -> (i32, i32) {
    %c0_i32 = arith.constant 0 : i32
    %c0_i32_0 = arith.constant 0 : i32
    %c0_i32_1 = arith.constant 0 : i32
    return %c0_i32, %c0_i32_0 : i32, i32
  }
  func.func @transform_3(%arg0: i32) -> (i32, i32) {
    %c0_i32 = arith.constant 0 : i32
    %c0_i32_0 = arith.constant 0 : i32
    %c0_i32_1 = arith.constant 0 : i32
    return %c0_i32, %c0_i32_0 : i32, i32
  }
  func.func @transform_4(%arg0: i32) -> (i32, i32) {
    %c0_i32 = arith.constant 0 : i32
    %c0_i32_0 = arith.constant 0 : i32
    %c0_i32_1 = arith.constant 0 : i32
    return %c0_i32, %c0_i32_0 : i32, i32
  }
  func.func @transform_5(%arg0: i32) -> (i32, i32) {
    %c0_i32 = arith.constant 0 : i32
    %c0_i32_0 = arith.constant 0 : i32
    %c0_i32_1 = arith.constant 0 : i32
    return %c0_i32, %c0_i32_0 : i32, i32
  }
  func.func @transform_6(%arg0: i32) -> (i32, i32) {
    %c0_i32 = arith.constant 0 : i32
    %c0_i32_0 = arith.constant 0 : i32
    %c0_i32_1 = arith.constant 0 : i32
    return %c0_i32, %c0_i32_0 : i32, i32
  }
  func.func @transform_7(%arg0: i32) -> (i32, i32) {
    %c0_i32 = arith.constant 0 : i32
    %c0_i32_0 = arith.constant 0 : i32
    return %arg0, %c0_i32 : i32, i32
  }
}

</mosaic_0001>

<bundles_post_ra>
// kernel: forward.1
= control target key start
LH: loop header
LB: loop body
LE: loop exit
PB: predicated region body
PF: predicated region fallthrough
CT: control target
= control target key end

     0   :  { %12 = vsyncpa [#allocation3], 0  ;;  %s478_s0 = inlined_call_operand.hbm [shape: f32[8,7], index: 0, kind: input, shape index: {}]   ;;  %s479_s1 = inlined_call_operand.vmem [shape: bf16[7,32], index: 1, kind: input, shape index: {}]   ;;  %s480_s2 = inlined_call_operand.vmem [shape: f32[1,32], index: 2, kind: input, shape index: {}]   ;;  %s481_s3 = inlined_call_operand.hbm [shape: bf16[32,32], index: 3, kind: input, shape index: {}]   ;;  %s482_s4 = inlined_call_operand.vmem [shape: f32[1,32], index: 4, kind: input, shape index: {}]   ;;  %s483_s5 = inlined_call_operand.vmem [shape: bf16[32,128], index: 5, kind: input, shape index: {}]   ;;  %s484_s6 = inlined_call_operand.vmem [shape: f32[1,128], index: 6, kind: input, shape index: {}]   ;;  %s485_s7 = inlined_call_operand.vmem [shape: bf16[8,128], index: 7, kind: output, shape index: {}]  }
   0x1   :  { %13 = vsyncpa [#allocation5], 0  ;;  %s379_s24 = smov [#allocation2]   ;;  %s380_s26 = smov [#allocation4]  }
   0x2   :  { %s20_s25 = sshll.u32 %s379_s24, 4  ;;  %s33_s27 = sshll.u32 %s380_s26, 4  ;;  %s21_s25 = int_to_ptr.vmem [resolvable:$true] %s20_s25  ;;  %s426_s27 = int_to_ptr.vmem [resolvable:$true] %s33_s27 }
   0x3   :  { %s331_s30 = scalar_lea.hbm %s478_s0, 128 }
   0x4   :  { %p332_p0 = scmp.ne.s32.totalorder %s478_s0, %s331_s30  ;;  %p335_p1 = scmp.lt.u32.totalorder %s331_s30, %s478_s0 }
   0x6   :  { %p337_p2 = pnand %p335_p1, %p332_p0 }
   0x8   :  { %340 = shalt.err (!%p337_p2)
}
   0x9   :  { %s341_s12 = scalar_lea.vmem %s21_s25, 128  ;;  %p346_p4 = scmp.lt.s32.totalorder %s21_s25, %s21_s25 }
   0xa   :  { %p342_p3 = scmp.ne.s32.totalorder %s21_s25, %s341_s12  ;;  %p347_p5 = scmp.lt.s32.totalorder %s341_s12, %s341_s12 }
   0xc   :  { %p348_p6 = por %p347_p5, %p346_p4 }
   0xe   :  { %p349_p7 = pnand %p348_p6, %p342_p3 }
  0x10   :  { %352 = shalt.err (!%p349_p7)
}
  0x11   :  { %23 = dma.hbm_to_vmem [thread:$0]  %s478_s0, 128, %s21_s25, [#allocation3]  }
  0x12   :  { %s353_s17 = scalar_lea.hbm %s481_s3, 256 }
  0x13   :  { %p354_p8 = scmp.ne.s32.totalorder %s481_s3, %s353_s17  ;;  %p357_p9 = scmp.lt.u32.totalorder %s353_s17, %s481_s3 }
  0x15   :  { %p359_p10 = pnand %p357_p9, %p354_p8 }
  0x17   :  { %362 = shalt.err (!%p359_p10)
}
  0x18   :  { %s363_s22 = scalar_lea.vmem %s426_s27, 256  ;;  %p368_p12 = scmp.lt.s32.totalorder %s426_s27, %s426_s27 }
  0x19   :  { %p364_p11 = scmp.ne.s32.totalorder %s426_s27, %s363_s22  ;;  %p369_p13 = scmp.lt.s32.totalorder %s363_s22, %s363_s22 }
  0x1b   :  { %p370_p0 = por %p369_p13, %p368_p12 }
  0x1d   :  { %p371_p1 = pnand %p370_p0, %p364_p11 }
  0x1f   :  { %374 = shalt.err (!%p371_p1)
}
  0x20   :  { %s381_s0 = smov 64   ;;  %s382_s23 = smov 4  }
  0x21   :  { %39 = dma.hbm_to_vmem [thread:$0]  %s481_s3, 256, %s426_s27, [#allocation5], %s381_s0, %s381_s0, %s382_s23  }
  0x22   :  { %375 = dma.done.wait [#allocation3], 128  }
  0x23   :  { %376 = vsyncadd [#allocation3], 4294967168 }
  0x24   :  { %377 = dma.done.wait [#allocation5], 256  }
  0x25   :  { %378 = vsyncadd [#allocation5], 4294967040  ;;  %vm67_vm0 = vcmask 1042432   ;;  %v383_v0 = vmov 0.0   ;;  %vm68_vm1 = vcmask 1043456   ;;  %v384_v1 = vmov 65535  }
  0x26   :  { %294 = vmatprep.subr.bf16.mxu0 %v383_v0  ;;  %300 = vmatprep.subr.bf16.mxu1 %v383_v0  ;;  %v69_v2 = vsel %vm67_vm0, 4294967295, %v384_v1  ;;  %vm385_vm2 = vmmov 0   ;;  %v55_v4 = vld [vmem:[%s479_s1] sm:$0xf]  ;;  %vm63_vm3 = vcmask 56320   ;;  %v323_v8 = vld [vmem:[#allocation4] sm:$0xff]   ;;  %v251_v28 = vlaneseq }
  0x27   :  { %296 = vmatprep.mubr.msk.bf16.mxu0 %vm385_vm2, %v383_v0  ;;  %304 = vmatprep.mubr.msk.bf16.mxu1 %vm385_vm2, %v383_v0  ;;  %v70_v3 = vsel %vm68_vm1, %v69_v2, 0  ;;  %v53_v5 = vld [vmem:[#allocation2] sm:$0xff]  ;;  %v324_v9 = vld [vmem:[#allocation4 + $0x8] sm:$0xff]   ;;  %vm139_vm4 = vcmask 261120   ;;  %v326_v19 = vld [vmem:[%s483_s5 + $0x8] sm:$0xff]  }
  0x28   :  { %v72_v6 = vand.u32 %v70_v3, %v55_v4  ;;  %v54_v7 = vpack.c.bf16 %v53_v5, %v53_v5  ;;  %301 = vmatpush3.bf16.msra.mxu1 %v323_v8  ;;  %v325_v10 = vld [vmem:[%s483_s5] sm:$0xff]   ;;  %v252_v29 = vand.u32 127, %v251_v28 }
  0x29   :  { %302 = vmatprep.subr.bf16.mxu1 %v383_v0  ;;  %v276_v11 = vld [vmem:[%s480_s2] ss:$0 sm:$0xff] }
  0x2a   :  { %295 = vmatpush3.bf16.msra.mxu0 %v72_v6  ;;  %v278_v20 = vld [vmem:[%s482_s4] ss:$0 sm:$0xff]  ;;  %vm253_vm5 = vcmp.ge.s32.totalorder %v252_v29, 64  ;;  %vm254_vm6 = vcmp.lt.s32.totalorder %v252_v29, 75  ;;  %vm266_vm8 = vcmp.lt.s32.totalorder %v252_v29, 64 }
  0x2b   :  { %308 = vmatprep.subr.bf16.mxu0 %v383_v0  ;;  %v282_v30 = vld [vmem:[%s484_s6] ss:$0 sm:$0xff]  ;;  %vm255_vm7 = vmand %vm253_vm5, %vm254_vm6 }
  0x2c   :  { %303 = vmatpush3.bf16.msra.mxu1 %v324_v9 }
  0x2d   :  { %297 = vmatmul.mubr.msk.bf16.vlgmr.msra.gmra.mrb[0].mxu0 %vm63_vm3, %v54_v7 }
  0x2e   :  { %312 = vmatprep.mubr.msk.bf16.mxu0 %vm385_vm2, %v383_v0  ;;  %309 = vmatpush3.bf16.msra.mxu0 %v325_v10 }
  0x2f   :  { %310 = vmatprep.subr.bf16.mxu0 %v383_v0 }
  0x32   :  { %311 = vmatpush3.bf16.msra.mxu0 %v326_v19 }
 0x100   :  { %v108_v12 = vpop.f32.mrb[0].mxu0 }
 0x101   :  { %v109_v13 = vadd.f32 %v276_v11, %v108_v12  ;;  %v298_v14 = vpop.f32.mrb[1].mxu0 }
 0x102   :  { %v111_v15 = vpop.f32.mrb[2].mxu0 }
 0x103   :  { %v114_v16 = vmax.f32 %v109_v13, 0.0  ;;  %v299_v17 = vpop.f32.mrb[3].mxu0 }
 0x105   :  { %v115_v18 = vpack.c.bf16 %v114_v16, %v114_v16 }
 0x107   :  { %305 = vmatmul.mubr.msk.bf16.vlgmr.msra.gmra.mrb[0].mxu1 %vm139_vm4, %v115_v18 }
 0x1da   :  { %v177_v21 = vpop.f32.mrb[0].mxu1 }
 0x1db   :  { %v178_v22 = vadd.f32 %v278_v20, %v177_v21  ;;  %v306_v23 = vpop.f32.mrb[1].mxu1 }
 0x1dc   :  { %v180_v24 = vpop.f32.mrb[2].mxu1 }
 0x1dd   :  { %v183_v25 = vmax.f32 %v178_v22, 0.0  ;;  %v307_v26 = vpop.f32.mrb[3].mxu1 }
 0x1df   :  { %v184_v27 = vpack.c.bf16 %v183_v25, %v183_v25 }
 0x1e1   :  { %313 = vmatmul.mubr.msk.bf16.vlgmr.msra.gmra.mrb[4].mxu0 %vm139_vm4, %v184_v27 }
 0x2b4   :  { %v245_v31 = vpop.f32.mrb[4].mxu0 }
 0x2b5   :  { %v246_v32 = vadd.f32 %v282_v30, %v245_v31  ;;  %v314_v33 = vpop.f32.mrb[5].mxu0 }
 0x2b6   :  { %v248_v34 = vpop.f32.mrb[6].mxu0 }
 0x2b7   :  { %v315_v35 = vpop.f32.mrb[7].mxu0  ;;  %v256_v36 = vsel %vm255_vm7, %v246_v32, -1e+30 }
 0x2b8   :  { %257 = vmax.xlane.f32.xlu0 %v256_v36 }
 0x345   :  { %v258_v37 = vpop.xlane.xlu0 %257 }
 0x346   :  { %v259_v38 = vsub.f32 %v256_v36, %v258_v37 }
 0x348   :  { %v260_v39 = vmul.f32 1.442695, %v259_v38 }
 0x34a   :  { %327 = vpow2.f32 %v260_v39 }
 0x354   :  { %v328_v40 = vpop.eup %327 }
 0x355   :  { %262 = vadd.xlane.f32.xlu0 %v328_v40 }
 0x3e2   :  { %v263_v41 = vpop.xlane.xlu0 %262 }
 0x3e3   :  { %329 = vrcp.f32 %v263_v41 }
 0x3ed   :  { %v330_v42 = vpop.eup %329 }
 0x3ee   :  { %v265_v43 = vmul.f32 %v330_v42, %v328_v40 }
 0x3f0   :  { %v267_v44 = vsel %vm266_vm8, %v246_v32, %v265_v43 }
 0x3f1   :  { %v268_v45 = vpack.c.bf16 %v267_v44, %v267_v44 }
 0x3f3   :  { %269 = vst [vmem:[%s485_s7] sm:$0xf] %v268_v45 }
 0x3f4   :  { %274 = vsyncpa [#allocation3], 1 }
 0x3f5   :  { %275 = vsyncpa [#allocation5], 1 }

</bundles_post_ra>
